<compile_context>
chip_gen: v5e
topology: v5e:2x2
jax: 0.10.0
libtpu: 0.0.40
codegen_flags: <defaults>
</compile_context>

<pallas_src>
import jax
import jax.numpy as jnp
from jax.experimental import pallas as pl
from jax.experimental.pallas import tpu as pltpu

_LANES = 128      # lane width of a vreg (fast axis)
_ROW_ALIGN = 32   # sublane alignment that is safe for dtypes down to 8-bit


def _sine_kernel(omega_ref, x_ref, o_ref):
    """Elementwise sin(omega * x) on one (row_tile, 128) lane-dense tile."""
    omega = omega_ref[0]                        # scalar from SMEM
    x = x_ref[...].astype(jnp.float32)          # compute in f32 regardless of storage dtype
    o_ref[...] = jnp.sin(omega * x).astype(o_ref.dtype)  # VPU mul + EUP sine


def sine_activation_forward(x, omega, *, row_tile=2048):
    """Apply y = sin(omega * x) elementwise via a Pallas TPU kernel.

    x:     any-shaped array (floating dtypes kept as-is; others promoted to f32).
    omega: python float / 0-d array (the module's scalar parameter).
    """
    orig_shape = x.shape

    # Match torch semantics: sin of an integer tensor produces a float tensor.
    if not jnp.issubdtype(x.dtype, jnp.floating):
        x = x.astype(jnp.float32)
    dtype = x.dtype

    n = x.size
    if n == 0:
        return x.reshape(orig_shape)

    # --- lane-dense layout: (rows, 128), rows padded to a multiple of rt ---
    rows = pl.cdiv(n, _LANES)

    rt = min(row_tile, rows)
    rt = max(_ROW_ALIGN, ((rt + _ROW_ALIGN - 1) // _ROW_ALIGN) * _ROW_ALIGN)

    padded_rows = ((rows + rt - 1) // rt) * rt
    padded_n = padded_rows * _LANES

    x_flat = jnp.ravel(x)                        # keep native dtype: no extra HBM traffic
    if padded_n != n:
        x_flat = jnp.pad(x_flat, (0, padded_n - n))
    x2d = x_flat.reshape(padded_rows, _LANES)

    omega_arr = jnp.asarray(omega, dtype=jnp.float32).reshape((1,))

    grid = (padded_rows // rt,)

    out2d = pl.pallas_call(
        _sine_kernel,
        out_shape=jax.ShapeDtypeStruct((padded_rows, _LANES), dtype),
        grid_spec=pl.GridSpec(
            grid=grid,
            in_specs=[
                # omega: tiny scalar parameter, resident in SMEM (no per-step DMA)
                pl.BlockSpec(memory_space=pltpu.MemorySpace.SMEM),
                # x: large lane-dense row tiles streamed through VMEM
                pl.BlockSpec((rt, _LANES), lambda i: (i, 0)),
            ],
            out_specs=pl.BlockSpec((rt, _LANES), lambda i: (i, 0)),
        ),
        compiler_params=pltpu.CompilerParams(
            dimension_semantics=("parallel",),   # lets v7x shard steps across its 2 TCs
        ),
    )(omega_arr, x2d)

    out = out2d.reshape(-1)
    if padded_n != n:
        out = out[:n]
    return out.reshape(orig_shape)


def sine_activation_ref(x, omega):
    """Pure-JAX reference of the same forward pass."""
    xf = x.astype(jnp.float32)
    return jnp.sin(jnp.float32(omega) * xf).astype(x.dtype)


if __name__ == "__main__":
    key = jax.random.PRNGKey(0)
    omega = 30.0  # typical SIREN-style omega; trainable=False in the reference module
    # TODO(synk): `trainable=True` (gradient w.r.t. omega) is a training concern; only the
    # forward pass is implemented here.

    # Small shapes consistent with an activation module: batch=2, channels=4, 16x16 spatial.
    x = jax.random.normal(key, (2, 4, 16, 16), dtype=jnp.float32)
    y = jax.block_until_ready(sine_activation_forward(x, omega))
    y_ref = sine_activation_ref(x, omega)
    assert y.shape == x.shape
    assert y.dtype == x.dtype
    assert jnp.allclose(y, y_ref, atol=1e-5, rtol=1e-5), "Pallas kernel mismatch vs reference (f32)"

    # Shape that is NOT a multiple of the tile / lane width.
    x2 = jax.random.normal(jax.random.PRNGKey(1), (3, 7, 5), dtype=jnp.float32)
    y2 = jax.block_until_ready(sine_activation_forward(x2, omega))
    assert jnp.allclose(y2, sine_activation_ref(x2, omega), atol=1e-5, rtol=1e-5)

    # bf16 input: streamed through the kernel in bf16 (half the HBM bytes), computed in f32.
    x3 = jax.random.normal(jax.random.PRNGKey(2), (2, 8, 32), dtype=jnp.bfloat16)
    y3 = jax.block_until_ready(sine_activation_forward(x3, omega))
    assert y3.dtype == jnp.bfloat16
    assert jnp.allclose(y3.astype(jnp.float32),
                        sine_activation_ref(x3, omega).astype(jnp.float32),
                        atol=2e-2, rtol=2e-2)

    print("KERNEL_OK")
</pallas_src>

<mosaic_0001>
module attributes {stable_mosaic.version = 11 : i64} {
  func.func @_sine_kernel(%arg0: i32, %arg1: memref<1xf32, #tpu.memory_space<smem>>, %arg2: memref<32x128xf32, #tpu.memory_space<vmem>>, %arg3: memref<32x128xf32, #tpu.memory_space<vmem>>) attributes {dimension_semantics = [#tpu.dimension_semantics<parallel>], iteration_bounds = array<i64: 1>, scalar_prefetch = 0 : i64, scratch_operands = 0 : i64, tpu.core_type = #tpu.core_type<tc>, window_params = [{transform_indices = @transform_0, window_bounds = array<i64: 1>}, {transform_indices = @transform_1, window_bounds = array<i64: 32, 128>}, {transform_indices = @transform_2, window_bounds = array<i64: 32, 128>}]} {
    %c0 = arith.constant 0 : index
    %0 = memref.load %arg1[%c0] : memref<1xf32, #tpu.memory_space<smem>>
    %c0_0 = arith.constant 0 : index
    %c0_1 = arith.constant 0 : index
    %1 = vector.load %arg2[%c0_0, %c0_1] : memref<32x128xf32, #tpu.memory_space<vmem>>, vector<32x128xf32>
    %2 = vector.broadcast %0 : f32 to vector<32x128xf32>
    %3 = arith.mulf %2, %1 : vector<32x128xf32>
    %4 = math.sin %3 : vector<32x128xf32>
    %c0_2 = arith.constant 0 : index
    %c0_3 = arith.constant 0 : index
    %5 = vector.load %arg3[%c0_2, %c0_3] : memref<32x128xf32, #tpu.memory_space<vmem>>, vector<32x128xf32>
    tpu.vector_store %arg3[%c0_2, %c0_3], %4 {strides = array<i32>} : memref<32x128xf32, #tpu.memory_space<vmem>>, vector<32x128xf32>,
    return
  }
  func.func @transform_0(%arg0: i32) -> i32 {
    %c0_i32 = arith.constant 0 : i32
    %c0_i32_0 = arith.constant 0 : i32
    return %c0_i32 : i32
  }
  func.func @transform_1(%arg0: i32) -> (i32, i32) {
    %c0_i32 = arith.constant 0 : i32
    %c0_i32_0 = arith.constant 0 : i32
    return %arg0, %c0_i32 : i32, i32
  }
  func.func @transform_2(%arg0: i32) -> (i32, i32) {
    %c0_i32 = arith.constant 0 : i32
    %c0_i32_0 = arith.constant 0 : i32
    return %arg0, %c0_i32 : i32, i32
  }
}

</mosaic_0001>

<bundles_post_ra>
// kernel: tpu_custom_call.1
= control target key start
LH: loop header
LB: loop body
LE: loop exit
PB: predicated region body
PF: predicated region fallthrough
CT: control target
= control target key end

     0   :  { %8 = vsyncpa [#allocation4], 0  ;;  %s1215_s0 = inlined_call_operand.<no memory space> [shape: f32[1], index: 0, kind: input, shape index: {}]   ;;  %s1216_s1 = inlined_call_operand.hbm [shape: f32[32,128], index: 1, kind: input, shape index: {}]   ;;  %s1217_s2 = inlined_call_operand.hbm [shape: f32[32,128], index: 2, kind: output, shape index: {}]  }
   0x1   :  { %9 = vsyncpa [#allocation5], 0  ;;  %s16_s11 = sshll.u32 %s1216_s1, 4  ;;  %s757_s12 = smov [#allocation3]   ;;  %s17_s11 = int_to_ptr.hbm [resolvable:$true] %s16_s11 }
   0x2   :  { %s18_s13 = sshll.u32 %s757_s12, 4  ;;  %s758_s14 = smov 128   ;;  %s19_s13 = int_to_ptr.vmem [resolvable:$true] %s18_s13 }
   0x3   :  { %s759_s15 = smov 8  }
   0x4   :  { %24 = dma.hbm_to_vmem [thread:$0]  %s17_s11, 512, %s19_s13, [#allocation4], %s758_s14, %s758_s14, %s759_s15  }
   0x5   :  { %753 = dma.done.wait [#allocation4], 512  }
   0x6   :  { %754 = vsyncadd [#allocation4], 4294966784  ;;  %v792_v0 = vstv %s1215_s0  ;;  %v30_v1 = vld [vmem:[#allocation3] sm:$0xff]  ;;  %v31_v2 = vld [vmem:[#allocation3 + $0x8] sm:$0xff]  ;;  %v760_v32 = vmov 683565275  }
   0x7   :  { %v32_v3 = vld [vmem:[#allocation3 + $0x10] sm:$0xff]  ;;  %v795_v4 = vmul.f32 %v792_v0, %v30_v1  ;;  %v798_v5 = vmul.f32 %v792_v0, %v31_v2  ;;  %v761_v34 = vmov 2475754826   ;;  %v762_v36 = vmov 2131351028   ;;  %s767_s0 = smov [#allocation6]  }
   0x8   :  { %v801_v6 = vmul.f32 %v792_v0, %v32_v3  ;;  %v763_v38 = vmov 2102212464   ;;  %v764_v40 = vmov 920167782   ;;  %v765_v49 = vmov 1326507024  }
   0x9   :  { %v39_v7 = vand.u32 2147483647, %v795_v4  ;;  %v42_v8 = vand.u32 2139095040, %v795_v4  ;;  %v194_v9 = vand.u32 2147483647, %v798_v5  ;;  %v197_v10 = vand.u32 2139095040, %v798_v5 }
   0xa   :  { %v352_v11 = vand.u32 2139095040, %v801_v6  ;;  %s667_s1 = sshll.u32 %s767_s0, 4  ;;  %s669_s20 = sshll.u32 %s1217_s2, 4  ;;  %s668_s1 = int_to_ptr.vmem [resolvable:$true] %s667_s1  ;;  %s670_s20 = int_to_ptr.hbm [resolvable:$true] %s669_s20 }
   0xb   :  { %v43_v12 = vshrl.u32 %v42_v8, 23  ;;  %v46_v13 = vand.u32 8388607, %v39_v7  ;;  %v198_v14 = vshrl.u32 %v197_v10, 23  ;;  %v201_v15 = vand.u32 8388607, %v194_v9 }
   0xc   :  { %v353_v19 = vshrl.u32 %v352_v11, 23 }
   0xd   :  { %v682_v16 = vadd.s32 4294967169, %v43_v12  ;;  %v47_v17 = vor.u32 8388608, %v46_v13  ;;  %v685_v18 = vadd.s32 4294967169, %v198_v14  ;;  %v202_v21 = vor.u32 8388608, %v201_v15 }
   0xe   :  { %v688_v25 = vadd.s32 4294967169, %v353_v19 }
   0xf   :  { %v49_v20 = vadd.s32 1, %v682_v16  ;;  %v204_v22 = vadd.s32 1, %v685_v18  ;;  %v812_v24 = vshll.u32 %v47_v17, 8  ;;  %v818_v30 = vshll.u32 %v202_v21, 8 }
  0x10   :  { %v826_v43 = vadd.s32 1, %v688_v25 }
  0x11   :  { %vm50_vm0 = vcmp.gt.s32.totalorder %v49_v20, 0  ;;  %vm205_vm1 = vcmp.gt.s32.totalorder %v204_v22, 0  ;;  %v88_v42 = vand.u32 65535, %v812_v24  ;;  %v89_v47 = vshrl.u32 %v812_v24, 16 }
  0x12   :  { %v51_v23 = vsel %vm50_vm0, %v49_v20, 0  ;;  %v206_v27 = vsel %vm205_vm1, %v204_v22, 0  ;;  %vm360_vm15 = vcmp.gt.s32.totalorder %v826_v43, 0 }
  0x13   :  { %v53_v26 = vand.u32 31, %v51_v23  ;;  %v814_v28 = vshrl.u32 %v51_v23, 5  ;;  %v816_v29 = vand.u32 31, %v206_v27  ;;  %v846_v60 = vshrl.u32 %v206_v27, 5 }
  0x15   :  { %v54_v31 = vsub.s32 32, %v53_v26  ;;  %v56_v33 = vshll.u32 %v760_v32, %v53_v26  ;;  %v59_v35 = vshll.u32 %v761_v34, %v53_v26  ;;  %v62_v37 = vshll.u32 %v762_v36, %v53_v26 }
  0x16   :  { %v65_v39 = vshll.u32 %v763_v38, %v53_v26  ;;  %v68_v41 = vshll.u32 %v764_v40, %v53_v26  ;;  %vm71_vm2 = vcmp.lt.s32.totalorder %v814_v28, 1  ;;  %vm74_vm3 = vcmp.lt.s32.totalorder %v814_v28, 4 }
  0x17   :  { %v57_v44 = vshrl.u32 %v761_v34, %v54_v31  ;;  %v60_v45 = vshrl.u32 %v762_v36, %v54_v31  ;;  %v63_v46 = vshrl.u32 %v763_v38, %v54_v31  ;;  %v66_v48 = vshrl.u32 %v764_v40, %v54_v31 }
  0x18   :  { %v69_v50 = vshrl.u32 %v765_v49, %v54_v31  ;;  %v837_v54 = vsub.s32 32, %v816_v29  ;;  %v55_v55 = vshrl.u32 %v760_v32, %v54_v31  ;;  %vm73_vm4 = vcmp.lt.s32.totalorder %v814_v28, 3 }
  0x19   :  { %v58_v51 = vor.u32 %v57_v44, %v56_v33  ;;  %v61_v52 = vor.u32 %v60_v45, %v59_v35  ;;  %v64_v53 = vor.u32 %v63_v46, %v62_v37  ;;  %v67_v56 = vor.u32 %v66_v48, %v65_v39 }
  0x1a   :  { %v70_v57 = vor.u32 %v69_v50, %v68_v41  ;;  %vm72_vm5 = vcmp.lt.s32.totalorder %v814_v28, 2  ;;  %v211_v63 = vshll.u32 %v760_v32, %v816_v29  ;;  %v214_v1 = vshll.u32 %v761_v34, %v816_v29 }
  0x1b   :  { %v79_v58 = vsel %vm71_vm2, %v58_v51, %v61_v52  ;;  %v83_v59 = vsel %vm71_vm2, %v61_v52, %v64_v53  ;;  %v80_v61 = vsel %vm74_vm3, %v67_v56, 920167782  ;;  %v76_v2 = vsel %vm74_vm3, %v64_v53, 2102212464 }
  0x1c   :  { %v84_v62 = vsel %vm74_vm3, %v70_v57, 1326507024  ;;  %v81_v3 = vsel %vm73_vm4, %v64_v53, %v80_v61  ;;  %v212_v10 = vshrl.u32 %v761_v34, %v837_v54  ;;  %v75_v11 = vsel %vm71_vm2, %v55_v55, %v58_v51 }
  0x1d   :  { %v85_v8 = vsel %vm73_vm4, %v67_v56, %v84_v62  ;;  %v82_v12 = vsel %vm72_vm5, %v79_v58, %v81_v3  ;;  %v215_v14 = vshrl.u32 %v762_v36, %v837_v54  ;;  %v77_v19 = vsel %vm73_vm4, %v61_v52, %v76_v2 }
  0x1e   :  { %v86_v13 = vsel %vm72_vm5, %v83_v59, %v85_v8  ;;  %v112_v17 = vand.u32 65535, %v82_v12  ;;  %v113_v18 = vshrl.u32 %v82_v12, 16  ;;  %v874_v20 = vor.u32 %v212_v10, %v211_v63 }
  0x1f   :  { %v90_v15 = vand.u32 65535, %v86_v13  ;;  %v91_v16 = vshrl.u32 %v86_v13, 16  ;;  %v876_v21 = vor.u32 %v215_v14, %v214_v1  ;;  %v217_v22 = vshll.u32 %v762_v36, %v816_v29 }
  0x20   :  { %v218_v27 = vshrl.u32 %v763_v38, %v837_v54  ;;  %v114_v33 = vmul.u32 %v112_v17, %v88_v42  ;;  %v115_v35 = vmul.u32 %v113_v18, %v88_v42  ;;  %v116_v37 = vmul.u32 %v112_v17, %v89_v47 }
  0x21   :  { %v92_v23 = vmul.u32 %v90_v15, %v88_v42  ;;  %v93_v25 = vmul.u32 %v91_v16, %v88_v42  ;;  %v94_v26 = vmul.u32 %v90_v15, %v89_v47  ;;  %v95_v31 = vmul.u32 %v91_v16, %v89_v47 }
  0x22   :  { %v117_v45 = vmul.u32 %v113_v18, %v89_v47  ;;  %v118_v48 = vshll.u32 %v115_v35, 16  ;;  %v119_v50 = vshrl.u32 %v115_v35, 16  ;;  %v120_v51 = vshll.u32 %v116_v37, 16 }
  0x23   :  { %v96_v39 = vshll.u32 %v93_v25, 16  ;;  %v97_v41 = vshrl.u32 %v93_v25, 16  ;;  %v98_v44 = vshll.u32 %v94_v26, 16  ;;  %v99_v46 = vshrl.u32 %v94_v26, 16 }
  0x24   :  { %v121_v53 = vshrl.u32 %v116_v37, 16  ;;  %v220_v55 = vshll.u32 %v763_v38, %v816_v29  ;;  %v766_v56 = vmov 0   ;;  %vm122_vm7 = vc.u32 %v114_v33, %v118_v48 }
  0x25   :  { %vm100_vm6 = vc.u32 %v92_v23, %v96_v39  ;;  %v102_v52 = vadd.s32 %v96_v39, %v92_v23  ;;  %v124_v42 = vadd.s32 %v118_v48, %v114_v33  ;;  %v221_v58 = vshrl.u32 %v764_v40, %v837_v54 }
  0x26   :  { %v101_v57 = vsel %vm100_vm6, 1, %v766_v56  ;;  %v123_v47 = vsel %vm122_vm7, 1, %v766_v56  ;;  %v223_v61 = vshll.u32 %v764_v40, %v816_v29  ;;  %v219_v1 = vor.u32 %v218_v27, %v217_v22 }
  0x27   :  { %v103_v59 = vadd.s32 %v101_v57, %v95_v31  ;;  %vm104_vm8 = vc.u32 %v102_v52, %v98_v44  ;;  %v125_v63 = vadd.s32 %v123_v47, %v117_v45  ;;  %vm126_vm9 = vc.u32 %v124_v42, %v120_v51 }
  0x28   :  { %v105_v62 = vsel %vm104_vm8, 1, %v766_v56  ;;  %v127_v3 = vsel %vm126_vm9, 1, %v766_v56  ;;  %v222_v8 = vor.u32 %v221_v58, %v220_v55  ;;  %v224_v10 = vshrl.u32 %v765_v49, %v837_v54 }
  0x29   :  { %v107_v2 = vadd.s32 %v105_v62, %v103_v59  ;;  %v894_v12 = vadd.s32 %v124_v42, %v120_v51  ;;  %v129_v13 = vadd.s32 %v127_v3, %v125_v63  ;;  %vm226_vm10 = vcmp.lt.s32.totalorder %v846_v60, 1 }
  0x2a   :  { %vm228_vm11 = vcmp.lt.s32.totalorder %v846_v60, 3  ;;  %v225_v14 = vor.u32 %v224_v10, %v223_v61  ;;  %vm227_vm12 = vcmp.lt.s32.totalorder %v846_v60, 2  ;;  %vm229_vm13 = vcmp.lt.s32.totalorder %v846_v60, 4 }
  0x2b   :  { %v108_v29 = vadd.s32 %v107_v2, %v97_v41  ;;  %v78_v15 = vsel %vm72_vm5, %v75_v11, %v77_v19  ;;  %v130_v16 = vadd.s32 %v129_v13, %v119_v50  ;;  %v234_v17 = vsel %vm226_vm10, %v874_v20, %v876_v21 }
  0x2c   :  { %v235_v18 = vsel %vm229_vm13, %v222_v8, 920167782  ;;  %v238_v25 = vsel %vm226_vm10, %v876_v21, %v219_v1  ;;  %v243_v28 = vand.u32 65535, %v818_v30  ;;  %v239_v26 = vsel %vm229_vm13, %v225_v14, 1326507024 }
  0x2d   :  { %v908_v22 = vadd.s32 %v108_v29, %v99_v46  ;;  %v236_v23 = vsel %vm228_vm11, %v219_v1, %v235_v18  ;;  %v131_v11 = vadd.s32 %v130_v16, %v121_v53  ;;  %v244_v27 = vshrl.u32 %v818_v30, 16 }
  0x2e   :  { %v237_v19 = vsel %vm227_vm12, %v234_v17, %v236_v23  ;;  %v132_v31 = vmul.u32 %v812_v24, %v78_v15  ;;  %v240_v33 = vsel %vm228_vm11, %v222_v8, %v239_v26  ;;  %v210_v44 = vshrl.u32 %v760_v32, %v837_v54 }
  0x2f   :  { %vm134_vm14 = vc.u32 %v908_v22, %v894_v12  ;;  %v267_v35 = vand.u32 65535, %v237_v19  ;;  %v135_v37 = vadd.s32 1, %v131_v11  ;;  %v241_v39 = vsel %vm227_vm12, %v238_v25, %v240_v33 }
  0x30   :  { %v268_v41 = vshrl.u32 %v237_v19, 16  ;;  %v245_v45 = vand.u32 65535, %v241_v39  ;;  %v246_v46 = vshrl.u32 %v241_v39, 16  ;;  %v231_v48 = vsel %vm229_vm13, %v219_v1, 2102212464 }
  0x31   :  { %v136_v24 = vsel %vm134_vm14, %v135_v37, %v131_v11  ;;  %v271_v51 = vmul.u32 %v267_v35, %v244_v27  ;;  %v269_v57 = vmul.u32 %v267_v35, %v243_v28  ;;  %v361_v59 = vsel %vm360_vm15, %v826_v43, 0 }
  0x32   :  { %v270_v50 = vmul.u32 %v268_v41, %v243_v28  ;;  %v137_v52 = vadd.s32 %v136_v24, %v132_v31  ;;  %v247_v53 = vmul.u32 %v245_v45, %v243_v28  ;;  %v248_v55 = vmul.u32 %v246_v46, %v243_v28 }
  0x33   :  { %v249_v42 = vmul.u32 %v245_v45, %v244_v27  ;;  %v230_v54 = vsel %vm226_vm10, %v210_v44, %v874_v20  ;;  %v250_v61 = vmul.u32 %v246_v46, %v244_v27  ;;  %v232_v63 = vsel %vm228_vm11, %v876_v21, %v231_v48 }
  0x34   :  { %v273_v58 = vshll.u32 %v270_v50, 16  ;;  %v138_v47 = vadd.s32 536870912, %v137_v52  ;;  %v251_v62 = vshll.u32 %v248_v55, 16  ;;  %v272_v2 = vmul.u32 %v268_v41, %v244_v27 }
  0x35   :  { %v253_v1 = vshll.u32 %v249_v42, 16  ;;  %v275_v3 = vshll.u32 %v271_v51, 16  ;;  %v252_v43 = vshrl.u32 %v248_v55, 16  ;;  %v274_v16 = vshrl.u32 %v270_v50, 16 }
  0x36   :  { %v940_v8 = vshrl.u32 %v138_v47, 30  ;;  %vm255_vm0 = vc.u32 %v247_v53, %v251_v62  ;;  %v257_v10 = vadd.s32 %v251_v62, %v247_v53  ;;  %vm277_vm1 = vc.u32 %v269_v57, %v273_v58 }
  0x37   :  { %v256_v13 = vsel %vm255_vm0, 1, %v766_v56  ;;  %v278_v29 = vsel %vm277_vm1, 1, %v766_v56  ;;  %v279_v20 = vadd.s32 %v273_v58, %v269_v57  ;;  %v363_v18 = vand.u32 31, %v361_v59 }
  0x38   :  { %v140_v14 = vshll.u32 %v940_v8, 30  ;;  %v258_v15 = vadd.s32 %v256_v13, %v250_v61  ;;  %vm259_vm2 = vc.u32 %v257_v10, %v253_v1  ;;  %v280_v17 = vadd.s32 %v278_v29, %v272_v2 }
  0x39   :  { %v260_v21 = vsel %vm259_vm2, 1, %v766_v56  ;;  %vm281_vm3 = vc.u32 %v279_v20, %v275_v3  ;;  %v254_v25 = vshrl.u32 %v249_v42, 16  ;;  %v276_v19 = vshrl.u32 %v271_v51, 16 }
  0x3a   :  { %v141_v23 = vsub.s32 %v137_v52, %v140_v14  ;;  %v262_v28 = vadd.s32 %v260_v21, %v258_v15  ;;  %v282_v11 = vsel %vm281_vm3, 1, %v766_v56  ;;  %v349_v27 = vand.u32 2147483647, %v801_v6 }
  0x3b   :  { %v284_v26 = vadd.s32 %v282_v11, %v280_v17  ;;  %v948_v35 = vadd.s32 %v279_v20, %v275_v3  ;;  %v233_v37 = vsel %vm227_vm12, %v230_v54, %v232_v63  ;;  %v364_v41 = vsub.s32 32, %v363_v18 }
  0x3c   :  { %vm142_vm4 = vcmp.lt.s32.totalorder %v141_v23, 0  ;;  %v143_v31 = vsub.s32 0, %v141_v23  ;;  %v263_v33 = vadd.s32 %v262_v28, %v252_v43  ;;  %vm41_vm5 = vcmp.lt.s32.totalorder %v795_v4, 0 }
  0x3d   :  { %v285_v39 = vadd.s32 %v284_v26, %v274_v16  ;;  %v133_v46 = vadd.s32 %v894_v12, %v908_v22  ;;  %v356_v50 = vand.u32 8388607, %v349_v27  ;;  %v163_v51 = vsub.s32 4, %v940_v8 }
  0x3e   :  { %v144_v44 = vsel %vm142_vm4, %v143_v31, %v141_v23  ;;  %v953_v45 = vadd.s32 %v263_v33, %v254_v25  ;;  %v287_v60 = vmul.u32 %v818_v30, %v233_v37  ;;  %v963_v52 = vshrl.u32 %v361_v59, 5 }
  0x3f   :  { %v145_v24 = vclz %v144_v44  ;;  %v286_v48 = vadd.s32 %v285_v39, %v276_v19  ;;  %vm967_vm7 = vcmp.le.f32.partialorder %v39_v7, 0.7853982  ;;  %v375_v55 = vshll.u32 %v763_v38, %v363_v18 }
  0x40   :  { %vm289_vm6 = vc.u32 %v953_v45, %v948_v35  ;;  %v376_v57 = vshrl.u32 %v764_v40, %v364_v41  ;;  %v366_v42 = vshll.u32 %v760_v32, %v363_v18  ;;  %v367_v30 = vshrl.u32 %v761_v34, %v364_v41 }
  0x41   :  { %v683_v12 = vadd.s32 4294967294, %v145_v24  ;;  %v290_v22 = vadd.s32 1, %v286_v48  ;;  %v369_v58 = vshll.u32 %v761_v34, %v363_v18  ;;  %v370_v59 = vshrl.u32 %v762_v36, %v364_v41 }
  0x42   :  { %v372_v7 = vshll.u32 %v762_v36, %v363_v18  ;;  %v373_v54 = vshrl.u32 %v763_v38, %v364_v41  ;;  %v378_v63 = vshll.u32 %v764_v40, %v363_v18  ;;  %v379_v1 = vshrl.u32 %v765_v49, %v364_v41 }
  0x43   :  { %vm684_vm8 = vcmp.lt.s32.totalorder %v683_v12, 0  ;;  %v291_v47 = vsel %vm289_vm6, %v290_v22, %v286_v48  ;;  %v377_v43 = vor.u32 %v376_v57, %v375_v55  ;;  %v164_v13 = vsel %vm41_vm5, %v163_v51, %v940_v8  ;;  %v33_v48 = vld [vmem:[#allocation3 + $0x18] sm:$0xff] }
  0x44   :  { %v148_v61 = vsel %vm684_vm8, 0, %v683_v12  ;;  %v292_v62 = vadd.s32 %v291_v47, %v287_v60  ;;  %v368_v20 = vor.u32 %v367_v30, %v366_v42  ;;  %v984_v14 = vor.u32 %v370_v59, %v369_v58 }
  0x45   :  { %v149_v2 = vsub.s32 32, %v148_v61  ;;  %v150_v3 = vshll.u32 %v141_v23, %v148_v61  ;;  %v153_v10 = vsub.s32 4294967266, %v148_v61  ;;  %v374_v21 = vor.u32 %v373_v54, %v372_v7 }
  0x46   :  { %v293_v29 = vadd.s32 536870912, %v292_v62  ;;  %vm381_vm9 = vcmp.lt.s32.totalorder %v963_v52, 1  ;;  %v380_v18 = vor.u32 %v379_v1, %v378_v63  ;;  %vm383_vm10 = vcmp.lt.s32.totalorder %v963_v52, 3 }
  0x47   :  { %v151_v15 = vshrl.u32 %v133_v46, %v149_v2  ;;  %v154_v16 = vadd.s32 127, %v153_v10  ;;  %vm384_vm11 = vcmp.lt.s32.totalorder %v963_v52, 4  ;;  %v357_v28 = vor.u32 8388608, %v356_v50 }
  0x48   :  { %v987_v17 = vshrl.u32 %v293_v29, 30  ;;  %v390_v8 = vsel %vm384_vm11, %v377_v43, 920167782  ;;  %v166_v11 = vsel %vm967_vm7, 0, %v164_v13  ;;  %vm382_vm12 = vcmp.lt.s32.totalorder %v963_v52, 2 }
  0x49   :  { %v152_v23 = vor.u32 %v151_v15, %v150_v3  ;;  %v155_v25 = vshll.u32 %v154_v16, 23  ;;  %v389_v33 = vsel %vm381_vm9, %v368_v20, %v984_v14  ;;  %v391_v37 = vsel %vm383_vm10, %v374_v21, %v390_v8 }
  0x4a   :  { %v295_v19 = vshll.u32 %v987_v17, 30  ;;  %v365_v44 = vshrl.u32 %v760_v32, %v364_v41  ;;  %v393_v46 = vsel %vm381_vm9, %v984_v14, %v374_v21  ;;  %v394_v24 = vsel %vm384_vm11, %v380_v18, 1326507024 }
  0x4b   :  { %v156_v26 = vor.u32 4788187, %v155_v25  ;;  %v159_v31 = vcvt.s32.f32 %v152_v23  ;;  %v183_v51 = vadd.s32 3, %v166_v11  ;;  %v395_v60 = vsel %vm383_vm10, %v377_v43, %v394_v24 }
  0x4c   :  { %v1002_v39 = vsub.s32 %v292_v62, %v295_v19  ;;  %v1012_v12 = vshll.u32 %v357_v28, 8  ;;  %v392_v41 = vsel %vm382_vm12, %v389_v33, %v391_v37  ;;  %v396_v55 = vsel %vm382_vm12, %v393_v46, %v395_v60 }
  0x4d   :  { %v157_v50 = vand.u32 2147483647, %v156_v26  ;;  %v400_v58 = vand.u32 65535, %v396_v55  ;;  %v1023_v59 = vmul.f32 %v792_v0, %v33_v48  ;;  %v401_v7 = vshrl.u32 %v396_v55, 16 }
  0x4e   :  { %vm297_vm13 = vcmp.lt.s32.totalorder %v1002_v39, 0  ;;  %v298_v22 = vsub.s32 0, %v1002_v39  ;;  %v398_v42 = vand.u32 65535, %v1012_v12  ;;  %v399_v30 = vshrl.u32 %v1012_v12, 16 }
  0x4f   :  { %v160_v57 = vmul.f32 %v159_v31, %v157_v50  ;;  %v288_v61 = vadd.s32 %v948_v35, %v953_v45  ;;  %v1030_v1 = vand.u32 3, %v183_v51  ;;  %v423_v10 = vshrl.u32 %v392_v41, 16 }
  0x50   :  { %v299_v47 = vsel %vm297_vm13, %v298_v22, %v1002_v39  ;;  %v1028_v63 = vmul.u32 %v400_v58, %v399_v30  ;;  %v402_v2 = vmul.u32 %v400_v58, %v398_v42  ;;  %v403_v3 = vmul.u32 %v401_v7, %v398_v42 }
  0x51   :  { %v161_v54 = vxor.u32 2147483648, %v160_v57  ;;  %v300_v62 = vclz %v299_v47  ;;  %v385_v13 = vsel %vm381_vm9, %v365_v44, %v368_v20  ;;  %v386_v29 = vsel %vm384_vm11, %v374_v21, 2102212464 }
  0x52   :  { %v406_v45 = vshll.u32 %v403_v3, 16  ;;  %v408_v15 = vshll.u32 %v1028_v63, 16  ;;  %v422_v16 = vand.u32 65535, %v392_v41  ;;  %vm196_vm14 = vcmp.lt.s32.totalorder %v798_v5, 0 }
  0x53   :  { %v162_v43 = vsel %vm41_vm5, %v161_v54, %v160_v57  ;;  %v686_v0 = vadd.s32 4294967294, %v300_v62  ;;  %v318_v20 = vsub.s32 4, %v987_v17  ;;  %v405_v23 = vmul.u32 %v401_v7, %v399_v30 }
  0x54   :  { %v1041_v35 = vsel %vm967_vm7, %v795_v4, %v162_v43  ;;  %vm410_vm0 = vc.u32 %v402_v2, %v406_v45  ;;  %v412_v21 = vadd.s32 %v406_v45, %v402_v2  ;;  %v1048_v28 = vmul.u32 %v423_v10, %v398_v42 }
  0x55   :  { %v167_v18 = vmul.f32 %v1041_v35, %v1041_v35  ;;  %vm687_vm15 = vcmp.lt.s32.totalorder %v686_v0, 0  ;;  %v411_v31 = vsel %vm410_vm0, 1, %v766_v56  ;;  %v1052_v33 = vmul.u32 %v422_v16, %v399_v30 }
  0x56   :  { %v303_v25 = vsel %vm687_vm15, 0, %v686_v0  ;;  %vm414_vm1 = vc.u32 %v412_v21, %v408_v15  ;;  %vm1056_vm2 = vcmp.le.f32.partialorder %v194_v9, 0.7853982  ;;  %v413_v48 = vadd.s32 %v411_v31, %v405_v23 }
  0x57   :  { %v168_v53 = vmul.f32 -0.001358992, %v167_v18  ;;  %v175_v8 = vmul.f32 -0.00019511016, %v167_v18  ;;  %v304_v11 = vsub.s32 32, %v303_v25  ;;  %v305_v19 = vshll.u32 %v1002_v39, %v303_v25 }
  0x58   :  { %v308_v26 = vsub.s32 4294967266, %v303_v25  ;;  %vm189_vm3 = vcmp.eq.s32.totalorder %v1030_v1, 2  ;;  %v387_v39 = vsel %vm383_vm10, %v984_v14, %v386_v29  ;;  %v407_v51 = vshrl.u32 %v403_v3, 16 }
  0x59   :  { %v169_v37 = vadd.f32 0.041655596, %v168_v53  ;;  %v176_v44 = vadd.f32 0.008332121, %v175_v8  ;;  %v306_v24 = vshrl.u32 %v288_v61, %v304_v11  ;;  %v424_v60 = vmul.u32 %v422_v16, %v398_v42 }
  0x5a   :  { %v309_v50 = vadd.s32 127, %v308_v26  ;;  %v415_v57 = vsel %vm414_vm1, 1, %v766_v56  ;;  %vm186_vm4 = vcmp.eq.s32.totalorder %v1030_v1, 0  ;;  %v427_v47 = vmul.u32 %v423_v10, %v399_v30 }
  0x5b   :  { %v170_v22 = vmul.f32 %v169_v37, %v167_v18  ;;  %v177_v41 = vmul.f32 %v176_v44, %v167_v18  ;;  %v307_v55 = vor.u32 %v306_v24, %v305_v19  ;;  %v417_v58 = vadd.s32 %v415_v57, %v413_v48 }
  0x5c   :  { %v310_v9 = vshll.u32 %v309_v50, 23  ;;  %v428_v7 = vshll.u32 %v1048_v28, 16  ;;  %v388_v62 = vsel %vm382_vm12, %v385_v13, %v387_v39  ;;  %v430_v14 = vshll.u32 %v1052_v33, 16 }
  0x5d   :  { %v171_v54 = vadd.f32 -0.4999988, %v170_v22  ;;  %v178_v61 = vadd.f32 -0.16666654, %v177_v41  ;;  %v314_v2 = vcvt.s32.f32 %v307_v55  ;;  %v319_v3 = vsel %vm196_vm14, %v318_v20, %v987_v17 }
  0x5e   :  { %v311_v42 = vor.u32 4788187, %v310_v9  ;;  %vm432_vm5 = vc.u32 %v424_v60, %v428_v7  ;;  %v434_v10 = vadd.s32 %v428_v7, %v424_v60  ;;  %v409_v45 = vshrl.u32 %v1028_v63, 16 }
  0x5f   :  { %v172_v43 = vmul.f32 %v171_v54, %v167_v18  ;;  %v179_v0 = vmul.f32 %v178_v61, %v167_v18  ;;  %v433_v30 = vsel %vm432_vm5, 1, %v766_v56  ;;  %v418_v15 = vadd.s32 %v417_v58, %v407_v51 }
  0x60   :  { %v312_v29 = vand.u32 2147483647, %v311_v42  ;;  %v435_v52 = vadd.s32 %v433_v30, %v427_v47  ;;  %v429_v23 = vshrl.u32 %v1048_v28, 16  ;;  %vm436_vm6 = vc.u32 %v434_v10, %v430_v14 }
  0x61   :  { %v173_v13 = vadd.f32 1.0, %v172_v43  ;;  %v180_v16 = vadd.f32 1.0, %v179_v0  ;;  %v321_v17 = vsel %vm1056_vm2, 0, %v319_v3  ;;  %v437_v20 = vsel %vm436_vm6, 1, %v766_v56 }
  0x62   :  { %v315_v25 = vmul.f32 %v314_v2, %v312_v29  ;;  %v507_v18 = vand.u32 2139095040, %v1023_v59  ;;  %v431_v63 = vshrl.u32 %v1052_v33, 16  ;;  %v439_v8 = vadd.s32 %v437_v20, %v435_v52 }
  0x63   :  { %v181_v21 = vmul.f32 %v180_v16, %v1041_v35  ;;  %v190_v53 = vxor.u32 2147483648, %v173_v13  ;;  %v1082_v19 = vadd.s32 %v418_v15, %v409_v45  ;;  %v1084_v26 = vadd.s32 %v434_v10, %v430_v14 }
  0x64   :  { %v316_v11 = vxor.u32 2147483648, %v315_v25  ;;  %v508_v28 = vshrl.u32 %v507_v18, 23  ;;  %vm185_vm7 = vcmp.lt.s32.totalorder %v1030_v1, 2  ;;  %v440_v44 = vadd.s32 %v439_v8, %v429_v23 }
  0x65   :  { %v187_v31 = vxor.u32 2147483648, %v181_v21  ;;  %v191_v37 = vsel %vm189_vm3, %v190_v53, %v181_v21  ;;  %vm182_vm8 = vweird.f32 %v795_v4  ;;  %v442_v33 = vmul.u32 %v1012_v12, %v388_v62 }
  0x66   :  { %v317_v35 = vsel %vm196_vm14, %v316_v11, %v315_v25  ;;  %v691_v24 = vadd.s32 4294967169, %v508_v28  ;;  %v338_v39 = vadd.s32 3, %v321_v17  ;;  %v441_v51 = vadd.s32 %v440_v44, %v431_v63 }
  0x67   :  { %v188_v48 = vsel %vm186_vm4, %v173_v13, %v187_v31  ;;  %v320_v50 = vsel %vm1056_vm2, %v798_v5, %v317_v35  ;;  %vm444_vm9 = vc.u32 %v1082_v19, %v1084_v26  ;;  %v504_v12 = vand.u32 2147483647, %v1023_v59 }
  0x68   :  { %v192_v60 = vsel %vm185_vm7, %v188_v48, %v191_v37  ;;  %v322_v22 = vmul.f32 %v320_v50, %v320_v50  ;;  %v514_v4 = vadd.s32 1, %v691_v24  ;;  %v445_v55 = vadd.s32 1, %v441_v51 }
  0x69   :  { %v193_v41 = vsel %vm182_vm8, nan, %v192_v60  ;;  %v339_v7 = vand.u32 3, %v338_v39  ;;  %v511_v2 = vand.u32 8388607, %v504_v12  ;;  %vm337_vm12 = vweird.f32 %v798_v5 }
  0x6a   :  { %v323_v57 = vmul.f32 -0.001358992, %v322_v22  ;;  %v330_v9 = vmul.f32 -0.00019511016, %v322_v22  ;;  %vm515_vm10 = vcmp.gt.s32.totalorder %v514_v4, 0  ;;  %659 = vst [vmem:[#allocation6] sm:$0xff] %v193_v41  ;;  %v446_v1 = vsel %vm444_vm9, %v445_v55, %v441_v51 }
  0x6b   :  { %v516_v58 = vsel %vm515_vm10, %v514_v4, 0  ;;  %v447_v54 = vadd.s32 %v446_v1, %v442_v33  ;;  %vm340_vm11 = vcmp.lt.s32.totalorder %v339_v7, 2  ;;  %vm344_vm13 = vcmp.eq.s32.totalorder %v339_v7, 2 }
  0x6c   :  { %v324_v46 = vadd.f32 0.041655596, %v323_v57  ;;  %v331_v47 = vadd.f32 0.008332121, %v330_v9  ;;  %v518_v61 = vand.u32 31, %v516_v58  ;;  %v1103_v3 = vshrl.u32 %v516_v58, 5 }
  0x6d   :  { %v448_v42 = vadd.s32 536870912, %v447_v54  ;;  %v512_v18 = vor.u32 8388608, %v511_v2  ;;  %vm341_vm0 = vcmp.eq.s32.totalorder %v339_v7, 0  ;;  %v443_v57 = vadd.s32 %v1084_v26, %v1082_v19 }
  0x6e   :  { %v325_v62 = vmul.f32 %v324_v46, %v322_v22  ;;  %v332_v14 = vmul.f32 %v331_v47, %v322_v22  ;;  %v1105_v43 = vsub.s32 32, %v518_v61  ;;  %v521_v0 = vshll.u32 %v760_v32, %v518_v61 }
  0x6f   :  { %v524_v30 = vshll.u32 %v761_v34, %v518_v61  ;;  %v1109_v45 = vshrl.u32 %v448_v42, 30  ;;  %v527_v15 = vshll.u32 %v762_v36, %v518_v61  ;;  %v530_v23 = vshll.u32 %v763_v38, %v518_v61 }
  0x70   :  { %v326_v10 = vadd.f32 -0.4999988, %v325_v62  ;;  %v333_v29 = vadd.f32 -0.16666654, %v332_v14  ;;  %v522_v52 = vshrl.u32 %v761_v34, %v1105_v43  ;;  %v525_v13 = vshrl.u32 %v762_v36, %v1105_v43 }
  0x71   :  { %v528_v16 = vshrl.u32 %v763_v38, %v1105_v43  ;;  %v450_v20 = vshll.u32 %v1109_v45, 30  ;;  %v531_v53 = vshrl.u32 %v764_v40, %v1105_v43  ;;  %vm536_vm14 = vcmp.lt.s32.totalorder %v1103_v3, 1 }
  0x72   :  { %v327_v25 = vmul.f32 %v326_v10, %v322_v22  ;;  %v334_v17 = vmul.f32 %v333_v29, %v322_v22  ;;  %v1121_v21 = vor.u32 %v522_v52, %v521_v0  ;;  %v1126_v8 = vor.u32 %v525_v13, %v524_v30 }
  0x73   :  { %v451_v63 = vsub.s32 %v447_v54, %v450_v20  ;;  %v1128_v11 = vor.u32 %v528_v16, %v527_v15  ;;  %v532_v38 = vor.u32 %v531_v53, %v530_v23  ;;  %v533_v28 = vshll.u32 %v764_v40, %v518_v61 }
  0x74   :  { %v328_v34 = vadd.f32 1.0, %v327_v25  ;;  %v335_v36 = vadd.f32 1.0, %v334_v17  ;;  %v534_v31 = vshrl.u32 %v765_v49, %v1105_v43  ;;  %vm538_vm1 = vcmp.lt.s32.totalorder %v1103_v3, 3 }
  0x75   :  { %vm452_vm15 = vcmp.lt.s32.totalorder %v451_v63, 0  ;;  %v453_v35 = vsub.s32 0, %v451_v63  ;;  %vm539_vm2 = vcmp.lt.s32.totalorder %v1103_v3, 4  ;;  %v1135_v33 = vshll.u32 %v512_v18, 8 }
  0x76   :  { %v336_v37 = vmul.f32 %v335_v36, %v320_v50  ;;  %v345_v44 = vxor.u32 2147483648, %v328_v34  ;;  %v535_v51 = vor.u32 %v534_v31, %v533_v28  ;;  %vm537_vm3 = vcmp.lt.s32.totalorder %v1103_v3, 2 }
  0x77   :  { %v454_v39 = vsel %vm452_vm15, %v453_v35, %v451_v63  ;;  %v544_v49 = vsel %vm536_vm14, %v1121_v21, %v1126_v8  ;;  %v545_v50 = vsel %vm539_vm2, %v532_v38, 920167782  ;;  %v548_v1 = vsel %vm536_vm14, %v1126_v8, %v1128_v11 }
  0x78   :  { %v342_v24 = vxor.u32 2147483648, %v336_v37  ;;  %v346_v48 = vsel %vm344_vm13, %v345_v44, %v336_v37  ;;  %v455_v40 = vclz %v454_v39  ;;  %v546_v22 = vsel %vm538_vm1, %v1128_v11, %v545_v50 }
  0x79   :  { %v547_v9 = vsel %vm537_vm3, %v544_v49, %v546_v22  ;;  %v549_v58 = vsel %vm539_vm2, %v535_v51, 1326507024  ;;  %v553_v46 = vand.u32 65535, %v1135_v33  ;;  %v554_v5 = vshrl.u32 %v1135_v33, 16 }
  0x7a   :  { %v343_v60 = vsel %vm341_vm0, %v328_v34, %v342_v24  ;;  %v689_v41 = vadd.s32 4294967294, %v455_v40  ;;  %v550_v19 = vsel %vm538_vm1, %v532_v38, %v549_v58  ;;  %v577_v26 = vand.u32 65535, %v547_v9 }
  0x7b   :  { %v347_v4 = vsel %vm340_vm11, %v343_v60, %v346_v48  ;;  %v578_v7 = vshrl.u32 %v547_v9, 16  ;;  %v551_v14 = vsel %vm537_vm3, %v548_v1, %v550_v19  ;;  %vm351_vm5 = vcmp.lt.s32.totalorder %v801_v6, 0 }
  0x7c   :  { %v348_v55 = vsel %vm337_vm12, nan, %v347_v4  ;;  %vm690_vm4 = vcmp.lt.s32.totalorder %v689_v41, 0  ;;  %v555_v42 = vand.u32 65535, %v551_v14  ;;  %v556_v30 = vshrl.u32 %v551_v14, 16 }
  0x7d   :  { %660 = vst [vmem:[#allocation6 + $0x8] sm:$0xff] %v348_v55  ;;  %v458_v47 = vsel %vm690_vm4, 0, %v689_v41  ;;  %v579_v29 = vmul.u32 %v577_v26, %v553_v46  ;;  %v580_v15 = vmul.u32 %v578_v7, %v553_v46  ;;  %v581_v52 = vmul.u32 %v577_v26, %v554_v5 }
  0x7e   :  { %v459_v54 = vsub.s32 32, %v458_v47  ;;  %v460_v61 = vshll.u32 %v451_v63, %v458_v47  ;;  %v463_v62 = vsub.s32 4294967266, %v458_v47  ;;  %v559_v10 = vmul.u32 %v555_v42, %v554_v5 }
  0x7f   :  { %vm1170_vm6 = vcmp.le.f32.partialorder %v349_v27, 0.7853982  ;;  %v557_v25 = vmul.u32 %v555_v42, %v553_v46  ;;  %v558_v17 = vmul.u32 %v556_v30, %v553_v46  ;;  %v520_v20 = vshrl.u32 %v760_v32, %v1105_v43 }
  0x80   :  { %v461_v2 = vshrl.u32 %v443_v57, %v459_v54  ;;  %v464_v0 = vadd.s32 127, %v463_v62  ;;  %v560_v18 = vmul.u32 %v556_v30, %v554_v5  ;;  %v582_v53 = vmul.u32 %v578_v7, %v554_v5 }
  0x81   :  { %v583_v34 = vshll.u32 %v580_v15, 16  ;;  %v561_v38 = vshll.u32 %v558_v17, 16  ;;  %v563_v28 = vshll.u32 %v559_v10, 16  ;;  %v473_v31 = vsub.s32 4, %v1109_v45 }
  0x82   :  { %v462_v16 = vor.u32 %v461_v2, %v460_v61  ;;  %v465_v23 = vshll.u32 %v464_v0, 23  ;;  %v541_v27 = vsel %vm539_vm2, %v1128_v11, 2102212464  ;;  %v585_v37 = vshll.u32 %v581_v52, 16 }
  0x83   :  { %vm587_vm7 = vc.u32 %v579_v29, %v583_v34  ;;  %vm565_vm8 = vc.u32 %v557_v25, %v561_v38  ;;  %v567_v35 = vadd.s32 %v561_v38, %v557_v25  ;;  %v540_v43 = vsel %vm536_vm14, %v520_v20, %v1121_v21 }
  0x84   :  { %v466_v36 = vor.u32 4788187, %v465_v23  ;;  %v469_v63 = vcvt.s32.f32 %v462_v16  ;;  %v588_v32 = vsel %vm587_vm7, 1, %v766_v56  ;;  %v566_v24 = vsel %vm565_vm8, 1, %v766_v56 }
  0x85   :  { %v589_v48 = vadd.s32 %v583_v34, %v579_v29  ;;  %v590_v39 = vadd.s32 %v588_v32, %v582_v53  ;;  %v562_v40 = vshrl.u32 %v558_v17, 16  ;;  %v568_v49 = vadd.s32 %v566_v24, %v560_v18 }
  0x86   :  { %v467_v44 = vand.u32 2147483647, %v466_v36  ;;  %vm569_vm9 = vc.u32 %v567_v35, %v563_v28  ;;  %v542_v11 = vsel %vm538_vm1, %v1126_v8, %v541_v27  ;;  %v584_v60 = vshrl.u32 %v580_v15, 16 }
  0x87   :  { %v570_v50 = vsel %vm569_vm9, 1, %v766_v56  ;;  %vm591_vm10 = vc.u32 %v589_v48, %v585_v37  ;;  %v564_v4 = vshrl.u32 %v559_v10, 16  ;;  %v586_v55 = vshrl.u32 %v581_v52, 16 }
  0x88   :  { %v470_v51 = vmul.f32 %v469_v63, %v467_v44  ;;  %v572_v41 = vadd.s32 %v570_v50, %v568_v49  ;;  %v592_v21 = vsel %vm591_vm10, 1, %v766_v56  ;;  %v474_v1 = vsel %vm351_vm5, %v473_v31, %v1109_v45 }
  0x89   :  { %v594_v57 = vadd.s32 %v592_v21, %v590_v39  ;;  %v593_v8 = vadd.s32 %v589_v48, %v585_v37  ;;  %v543_v5 = vsel %vm537_vm3, %v540_v43, %v542_v11  ;;  %v476_v26 = vsel %vm1170_vm6, 0, %v474_v1 }
  0x8a   :  { %v471_v22 = vxor.u32 2147483648, %v470_v51  ;;  %v573_v58 = vadd.s32 %v572_v41, %v562_v40  ;;  %v597_v45 = vmul.u32 %v1135_v33, %v543_v5  ;;  %v493_v2 = vadd.s32 3, %v476_v26 }
  0x8b   :  { %v595_v47 = vadd.s32 %v594_v57, %v584_v60  ;;  %vm492_vm0 = vweird.f32 %v801_v6  ;;  %vm506_vm2 = vcmp.lt.s32.totalorder %v1023_v59, 0  ;;  %vm505_vm3 = vcmp.le.f32.partialorder %v504_v12, 0.7853982 }
  0x8c   :  { %v472_v9 = vsel %vm351_vm5, %v471_v22, %v470_v51  ;;  %v574_v19 = vadd.s32 %v573_v58, %v564_v4  ;;  %v494_v16 = vand.u32 3, %v493_v2  ;;  %vm647_vm7 = vweird.f32 %v1023_v59 }
  0x8d   :  { %v475_v46 = vsel %vm1170_vm6, %v801_v6, %v472_v9  ;;  %v596_v7 = vadd.s32 %v595_v47, %v586_v55 }
  0x8e   :  { %v477_v56 = vmul.f32 %v475_v46, %v475_v46  ;;  %vm599_vm11 = vc.u32 %v574_v19, %v593_v8  ;;  %vm499_vm12 = vcmp.eq.s32.totalorder %v494_v16, 2  ;;  %vm495_vm13 = vcmp.lt.s32.totalorder %v494_v16, 2 }
  0x8f   :  { %v600_v62 = vadd.s32 1, %v596_v7  ;;  %vm496_vm14 = vcmp.eq.s32.totalorder %v494_v16, 0  ;;  %v598_v32 = vadd.s32 %v593_v8, %v574_v19 }
  0x90   :  { %v478_v54 = vmul.f32 -0.001358992, %v477_v56  ;;  %v485_v61 = vmul.f32 -0.00019511016, %v477_v56 }
  0x91   :  { %v601_v0 = vsel %vm599_vm11, %v600_v62, %v596_v7 }
  0x92   :  { %v479_v14 = vadd.f32 0.041655596, %v478_v54  ;;  %v486_v42 = vadd.f32 0.008332121, %v485_v61  ;;  %v602_v10 = vadd.s32 %v601_v0, %v597_v45 }
  0x94   :  { %v480_v30 = vmul.f32 %v479_v14, %v477_v56  ;;  %v487_v3 = vmul.f32 %v486_v42, %v477_v56  ;;  %v603_v52 = vadd.s32 536870912, %v602_v10 }
  0x96   :  { %v481_v29 = vadd.f32 -0.4999988, %v480_v30  ;;  %v488_v15 = vadd.f32 -0.16666654, %v487_v3  ;;  %v604_v25 = vshrl.u32 %v603_v52, 30 }
  0x98   :  { %v482_v13 = vmul.f32 %v481_v29, %v477_v56  ;;  %v489_v23 = vmul.f32 %v488_v15, %v477_v56  ;;  %v605_v18 = vshll.u32 %v604_v25, 30  ;;  %v628_v4 = vsub.s32 4, %v604_v25 }
  0x9a   :  { %v483_v17 = vadd.f32 1.0, %v482_v13  ;;  %v490_v20 = vadd.f32 1.0, %v489_v23  ;;  %v606_v34 = vsub.s32 %v602_v10, %v605_v18  ;;  %v629_v55 = vsel %vm506_vm2, %v628_v4, %v604_v25 }
  0x9b   :  { %v631_v1 = vsel %vm505_vm3, 0, %v629_v55 }
  0x9c   :  { %v491_v33 = vmul.f32 %v490_v20, %v475_v46  ;;  %v500_v53 = vxor.u32 2147483648, %v483_v17  ;;  %vm607_vm15 = vcmp.lt.s32.totalorder %v606_v34, 0  ;;  %v608_v38 = vsub.s32 0, %v606_v34 }
  0x9d   :  { %v648_v47 = vadd.s32 3, %v631_v1 }
  0x9e   :  { %v497_v36 = vxor.u32 2147483648, %v491_v33  ;;  %v501_v63 = vsel %vm499_vm12, %v500_v53, %v491_v33  ;;  %v609_v31 = vsel %vm607_vm15, %v608_v38, %v606_v34 }
  0x9f   :  { %v610_v37 = vclz %v609_v31  ;;  %v649_v54 = vand.u32 3, %v648_v47 }
  0xa0   :  { %v498_v28 = vsel %vm496_vm14, %v483_v17, %v497_v36 }
  0xa1   :  { %v502_v27 = vsel %vm495_vm13, %v498_v28, %v501_v63  ;;  %v692_v35 = vadd.s32 4294967294, %v610_v37  ;;  %vm654_vm4 = vcmp.eq.s32.totalorder %v649_v54, 2  ;;  %vm651_vm5 = vcmp.eq.s32.totalorder %v649_v54, 0 }
  0xa2   :  { %v503_v44 = vsel %vm492_vm0, nan, %v502_v27  ;;  %vm650_vm6 = vcmp.lt.s32.totalorder %v649_v54, 2 }
  0xa3   :  { %661 = vst [vmem:[#allocation6 + $0x10] sm:$0xff] %v503_v44  ;;  %vm693_vm1 = vcmp.lt.s32.totalorder %v692_v35, 0 }
  0xa4   :  { %v613_v43 = vsel %vm693_vm1, 0, %v692_v35 }
  0xa5   :  { %v614_v24 = vsub.s32 32, %v613_v43  ;;  %v615_v48 = vshll.u32 %v606_v34, %v613_v43  ;;  %v618_v39 = vsub.s32 4294967266, %v613_v43 }
  0xa7   :  { %v616_v51 = vshrl.u32 %v598_v32, %v614_v24  ;;  %v619_v40 = vadd.s32 127, %v618_v39 }
  0xa9   :  { %v617_v49 = vor.u32 %v616_v51, %v615_v48  ;;  %v620_v11 = vshll.u32 %v619_v40, 23 }
  0xab   :  { %v621_v50 = vor.u32 4788187, %v620_v11  ;;  %v624_v60 = vcvt.s32.f32 %v617_v49 }
  0xad   :  { %v622_v6 = vand.u32 2147483647, %v621_v50 }
  0xaf   :  { %v625_v22 = vmul.f32 %v624_v60, %v622_v6 }
  0xb1   :  { %v626_v41 = vxor.u32 2147483648, %v625_v22 }
  0xb3   :  { %v627_v21 = vsel %vm506_vm2, %v626_v41, %v625_v22 }
  0xb4   :  { %v630_v57 = vsel %vm505_vm3, %v1023_v59, %v627_v21 }
  0xb5   :  { %v632_v9 = vmul.f32 %v630_v57, %v630_v57 }
  0xb7   :  { %v633_v58 = vmul.f32 -0.001358992, %v632_v9  ;;  %v640_v8 = vmul.f32 -0.00019511016, %v632_v9 }
  0xb9   :  { %v634_v46 = vadd.f32 0.041655596, %v633_v58  ;;  %v641_v5 = vadd.f32 0.008332121, %v640_v8 }
  0xbb   :  { %v635_v56 = vmul.f32 %v634_v46, %v632_v9  ;;  %v642_v19 = vmul.f32 %v641_v5, %v632_v9 }
  0xbd   :  { %v636_v26 = vadd.f32 -0.4999988, %v635_v56  ;;  %v643_v7 = vadd.f32 -0.16666654, %v642_v19 }
  0xbf   :  { %v637_v61 = vmul.f32 %v636_v26, %v632_v9  ;;  %v644_v45 = vmul.f32 %v643_v7, %v632_v9 }
  0xc1   :  { %v638_v12 = vadd.f32 1.0, %v637_v61  ;;  %v645_v62 = vadd.f32 1.0, %v644_v45 }
  0xc3   :  { %v646_v14 = vmul.f32 %v645_v62, %v630_v57  ;;  %v655_v42 = vxor.u32 2147483648, %v638_v12 }
  0xc5   :  { %v652_v2 = vxor.u32 2147483648, %v646_v14  ;;  %v656_v0 = vsel %vm654_vm4, %v655_v42, %v646_v14 }
  0xc7   :  { %v653_v30 = vsel %vm651_vm5, %v638_v12, %v652_v2 }
  0xc8   :  { %v657_v3 = vsel %vm650_vm6, %v653_v30, %v656_v0 }
  0xc9   :  { %v658_v10 = vsel %vm647_vm7, nan, %v657_v3 }
  0xca   :  { %662 = vst [vmem:[#allocation6 + $0x18] sm:$0xff] %v658_v10 }
  0xcb   :  { %675 = dma.vmem_to_hbm [thread:$0]  %s668_s1, 512, %s670_s20, [#allocation5], %s758_s14, %s758_s14, %s759_s15  }
  0xcc   :  { %755 = dma.done.wait [#allocation5], 512  }
  0xcd   :  { %756 = vsyncadd [#allocation5], 4294966784 }
  0xce   :  { %680 = vsyncpa [#allocation4], 1 }
  0xcf   :  { %681 = vsyncpa [#allocation5], 1 }

</bundles_post_ra>
